<compile_context>
chip_gen: v6e
topology: v6e:2x2x1
jax: 0.10.0
libtpu: 0.0.40
codegen_flags: <defaults>
</compile_context>

<pallas_src>
import functools

import jax
import jax.numpy as jnp
from jax.experimental import pallas as pl
from jax.experimental.pallas import tpu as pltpu

# Synthetic "max_movies" (the real script derives it from ml-1m data).
# Chosen lane-aligned (multiple of 128).
MAX_MOVIES = 256
H1 = 20
H2 = 10

_MIN_GRID_STEPS = 8   # ~4 pipelined grid steps per TensorCore on v7x (2 TCs)


def _round_up(n, m):
    return ((n + m - 1) // m) * m


def _padded_vmem_bytes(shape, dtype):
    """VMEM footprint of one buffer holding `shape` after (sublane, lane) padding."""
    dt = jnp.dtype(dtype)
    if len(shape) == 1:
        lead, sub, lane = 1, 1, int(shape[0])
    else:
        lead = 1
        for d in shape[:-2]:
            lead *= int(d)
        sub, lane = int(shape[-2]), int(shape[-1])
    packing = max(1, 4 // dt.itemsize)            # 1 for f32, 2 for bf16
    return lead * _round_up(sub, 8 * packing) * _round_up(lane, 128) * dt.itemsize


def _autoencoder_kernel(x_ref,
                        w1_ref, b1_ref,
                        w2_ref, b2_ref,
                        w3_ref, b3_ref,
                        w4_ref, b4_ref,
                        o_ref):
    """Whole 4-layer MLP hot path for one batch tile.

    x_ref:  (TB, M)   batch tile (io dtype: bf16 fast path or f32)
    wN_ref: (in, out) full weight matrices in io dtype (VMEM-resident)
    bN_ref: (1, out)  biases, f32 (added after f32 accumulation)
    o_ref:  (TB, M)   reconstruction tile (io dtype)
    """
    cdt = x_ref.dtype   # MXU operand dtype (bf16 on the fast path)

    h = jnp.dot(x_ref[...], w1_ref[...],
                preferred_element_type=jnp.float32) + b1_ref[...]
    h = jax.nn.sigmoid(h)                                     # f32 VPU/EUP

    h = jnp.dot(h.astype(cdt), w2_ref[...],
                preferred_element_type=jnp.float32) + b2_ref[...]
    h = jax.nn.sigmoid(h)

    h = jnp.dot(h.astype(cdt), w3_ref[...],
                preferred_element_type=jnp.float32) + b3_ref[...]
    h = jax.nn.sigmoid(h)

    out = jnp.dot(h.astype(cdt), w4_ref[...],
                  preferred_element_type=jnp.float32) + b4_ref[...]
    o_ref[...] = out.astype(o_ref.dtype)


@functools.partial(jax.jit, static_argnames=("tb", "io_dtype"))
def autoencoder_forward(x, params, *, tb=None, io_dtype=jnp.bfloat16):
    """x: (B, M). params: dict of w1..w4, b1..b4 (f32).

    io_dtype: dtype of x/out and the MXU operands (bf16 fast path by default;
              accumulation and sigmoids are always f32).
    tb: optional max batch-tile; default is 4096 rows (bf16) / 2048 (f32),
        automatically capped so short batches still give each TensorCore
        several pipelined grid steps.
    Returns the reconstruction in io_dtype with shape (B, M).
    """
    B, M = x.shape
    io_dt = jnp.dtype(io_dtype)
    w1, b1 = params["w1"], params["b1"]
    w2, b2 = params["w2"], params["b2"]
    w3, b3 = params["w3"], params["b3"]
    w4, b4 = params["w4"], params["b4"]

    # ---- Tile selection: batch- and dtype-aware ------------------------------
    tb_max = int(tb) if tb is not None else (4096 if io_dt.itemsize < 4 else 2048)
    if B <= 128:
        tb_eff = max(16, _round_up(B, 16))        # one small tile (16 = bf16 sublanes)
    else:
        # Cap so the grid has >= _MIN_GRID_STEPS steps (pipeline overlap on both
        # v7x TensorCores), but never shrink below 128 rows.
        tb_cap = _round_up(pl.cdiv(B, _MIN_GRID_STEPS), 128)
        tb_eff = max(128, min(tb_max, tb_cap))
    grid = (pl.cdiv(B, tb_eff),)                  # partial last tile: Pallas clips writes

    # ---- Boundary casts (bf16 fast path halves x/out HBM bytes) --------------
    # Callers that already hold x in io_dtype avoid the cast pass entirely.
    x_in = x.astype(io_dt)
    w1c, w2c, w3c, w4c = (w.astype(io_dt) for w in (w1, w2, w3, w4))
    b1c, b2c, b3c, b4c = (b.astype(jnp.float32) for b in (b1, b2, b3, b4))

    # Weights/biases: full blocks with constant block index -> loaded once,
    # resident in VMEM across all batch-tile steps.
    def _full(a):
        return pl.BlockSpec(a.shape, lambda i, _n=a.ndim: (0,) * _n)

    # ---- VMEM budget from padded layouts --------------------------------------
    io_bytes = 2 * 2 * _padded_vmem_bytes((tb_eff, M), io_dt)      # x + out, 2 bufs each
    weight_bytes = 2 * sum(_padded_vmem_bytes(a.shape, a.dtype)
                           for a in (w1c, b1c, w2c, b2c, w3c, b3c, w4c, b4c))
    act_bytes = 6 * tb_eff * max(M, 128) * 4      # f32 activation temporaries (generous)
    vmem_budget = io_bytes + weight_bytes + act_bytes + (4 << 20)  # + margin/internal
    vmem_budget = int(min(max(vmem_budget, 8 << 20), 56 << 20))    # <= v7x 64 MiB phys

    out = pl.pallas_call(
        _autoencoder_kernel,
        out_shape=jax.ShapeDtypeStruct((B, M), io_dt),
        grid_spec=pltpu.PrefetchScalarGridSpec(
            num_scalar_prefetch=0,
            grid=grid,
            in_specs=[
                pl.BlockSpec((tb_eff, M), lambda i: (i, 0)),       # x (batch-tiled)
                _full(w1c), _full(b1c),
                _full(w2c), _full(b2c),
                _full(w3c), _full(b3c),
                _full(w4c), _full(b4c),
            ],
            out_specs=pl.BlockSpec((tb_eff, M), lambda i: (i, 0)),
        ),
        compiler_params=pltpu.CompilerParams(
            dimension_semantics=("parallel",),    # shard batch tiles across TCs (v7x)
            vmem_limit_bytes=vmem_budget),
    )(x_in, w1c, b1c, w2c, b2c, w3c, b3c, w4c, b4c)

    return out


def init_params(key, n_movies=MAX_MOVIES):
    """Deterministic init mimicking nn.Linear's U(-1/sqrt(fan_in), +1/sqrt(fan_in))."""
    dims = [(n_movies, H1), (H1, H2), (H2, H1), (H1, n_movies)]
    params = {}
    keys = jax.random.split(key, 2 * len(dims))
    for idx, (fan_in, fan_out) in enumerate(dims):
        bound = 1.0 / jnp.sqrt(jnp.float32(fan_in))
        w = jax.random.uniform(keys[2 * idx], (fan_in, fan_out),
                               minval=-bound, maxval=bound, dtype=jnp.float32)
        b = jax.random.uniform(keys[2 * idx + 1], (1, fan_out),
                               minval=-bound, maxval=bound, dtype=jnp.float32)
        params[f"w{idx + 1}"] = w
        params[f"b{idx + 1}"] = b
    return params


def reference_forward(x, p, compute_dtype=jnp.float32):
    """Pure-JAX reference; compute_dtype mirrors the kernel's MXU operand dtype."""
    cdt = compute_dtype

    def lin(h, w, b):
        return jnp.dot(h.astype(cdt), w.astype(cdt),
                       preferred_element_type=jnp.float32) + b

    h = jax.nn.sigmoid(lin(x, p["w1"], p["b1"]))
    h = jax.nn.sigmoid(lin(h, p["w2"], p["b2"]))
    h = jax.nn.sigmoid(lin(h, p["w3"], p["b3"]))
    return lin(h, p["w4"], p["b4"])


if __name__ == "__main__":
    key = jax.random.PRNGKey(0)
    k_x, k_p = jax.random.split(key)

    # Non-multiple-of-128 batch: exercises the clipped partial boundary tile
    # (no wrapper pad/slice) and a multi-step grid (tb_eff=128 -> 3 steps).
    batch = 300
    # Ratings-style non-negative input in [0, 5].
    x = jax.random.uniform(k_x, (batch, MAX_MOVIES),
                           minval=0.0, maxval=5.0, dtype=jnp.float32)
    params = init_params(k_p)

    # Fast path: bf16 I/O + bf16 MXU operands, f32 accumulation / sigmoid.
    out_bf16 = jax.block_until_ready(autoencoder_forward(x, params))
    assert out_bf16.shape == (batch, MAX_MOVIES)
    assert out_bf16.dtype == jnp.bfloat16
    ref_bf16 = reference_forward(x, params, compute_dtype=jnp.bfloat16)
    assert jnp.allclose(out_bf16.astype(jnp.float32), ref_bf16,
                        atol=2e-2, rtol=2e-2), "bf16 path mismatch vs JAX reference"

    # Strict f32 path vs. the exact f32 reference.
    out_f32 = jax.block_until_ready(
        autoencoder_forward(x, params, io_dtype=jnp.float32))
    ref_f32 = reference_forward(x, params)
    assert jnp.allclose(out_f32, ref_f32,
                        atol=1e-4, rtol=1e-4), "f32 path mismatch vs JAX reference"

    print("KERNEL_OK")
</pallas_src>

<mosaic_0001>
module attributes {stable_mosaic.version = 11 : i64} {
  func.func @_autoencoder_kernel(%arg0: i32, %arg1: memref<128x256xbf16, #tpu.memory_space<vmem>>, %arg2: memref<256x20xbf16, #tpu.memory_space<vmem>>, %arg3: memref<1x20xf32, #tpu.memory_space<vmem>>, %arg4: memref<20x10xbf16, #tpu.memory_space<vmem>>, %arg5: memref<1x10xf32, #tpu.memory_space<vmem>>, %arg6: memref<10x20xbf16, #tpu.memory_space<vmem>>, %arg7: memref<1x20xf32, #tpu.memory_space<vmem>>, %arg8: memref<20x256xbf16, #tpu.memory_space<vmem>>, %arg9: memref<1x256xf32, #tpu.memory_space<vmem>>, %arg10: memref<128x256xbf16, #tpu.memory_space<vmem>>) attributes {dimension_semantics = [#tpu.dimension_semantics<parallel>], iteration_bounds = array<i64: 3>, scalar_prefetch = 0 : i64, scratch_operands = 0 : i64, tpu.core_type = #tpu.core_type<tc>, window_params = [{transform_indices = @transform_0, window_bounds = array<i64: 128, 256>}, {pipeline_mode = #tpu.pipeline_mode<synchronous>, transform_indices = @transform_1, window_bounds = array<i64: 256, 20>}, {pipeline_mode = #tpu.pipeline_mode<synchronous>, transform_indices = @transform_2, window_bounds = array<i64: 1, 20>}, {pipeline_mode = #tpu.pipeline_mode<synchronous>, transform_indices = @transform_3, window_bounds = array<i64: 20, 10>}, {pipeline_mode = #tpu.pipeline_mode<synchronous>, transform_indices = @transform_4, window_bounds = array<i64: 1, 10>}, {pipeline_mode = #tpu.pipeline_mode<synchronous>, transform_indices = @transform_5, window_bounds = array<i64: 10, 20>}, {pipeline_mode = #tpu.pipeline_mode<synchronous>, transform_indices = @transform_6, window_bounds = array<i64: 1, 20>}, {pipeline_mode = #tpu.pipeline_mode<synchronous>, transform_indices = @transform_7, window_bounds = array<i64: 20, 256>}, {pipeline_mode = #tpu.pipeline_mode<synchronous>, transform_indices = @transform_8, window_bounds = array<i64: 1, 256>}, {transform_indices = @transform_9, window_bounds = array<i64: 128, 256>}]} {
    %c0 = arith.constant 0 : index
    %c0_0 = arith.constant 0 : index
    %0 = vector.load %arg1[%c0, %c0_0] : memref<128x256xbf16, #tpu.memory_space<vmem>>, vector<128x256xbf16>
    %c0_1 = arith.constant 0 : index
    %c0_2 = arith.constant 0 : index
    %1 = vector.load %arg2[%c0_1, %c0_2] : memref<256x20xbf16, #tpu.memory_space<vmem>>, vector<256x20xbf16>
    %cst = arith.constant dense<0.000000e+00> : vector<128x20xf32>
    %2 = tpu.matmul %0, %1, %cst {dimension_numbers = #tpu.dot_dimension_numbers<[1], [0], [0], [1], [0, 0, 1, 1], [], []>} : vector<128x256xbf16>, vector<256x20xbf16>, vector<128x20xf32> -> vector<128x20xf32>
    %c0_3 = arith.constant 0 : index
    %c0_4 = arith.constant 0 : index
    %3 = vector.load %arg3[%c0_3, %c0_4] : memref<1x20xf32, #tpu.memory_space<vmem>>, vector<1x20xf32>
    %4 = vector.broadcast %3 : vector<1x20xf32> to vector<128x20xf32>
    %5 = arith.addf %2, %4 : vector<128x20xf32>
    %6 = arith.negf %5 : vector<128x20xf32>
    %7 = math.exp %6 : vector<128x20xf32>
    %cst_5 = arith.constant 1.000000e+00 : f32
    %8 = vector.broadcast %cst_5 : f32 to vector<128x20xf32>
    %9 = arith.addf %8, %7 : vector<128x20xf32>
    %10 = arith.divf %8, %9 : vector<128x20xf32>
    %11 = arith.truncf %10 : vector<128x20xf32> to vector<128x20xbf16>
    %c0_6 = arith.constant 0 : index
    %c0_7 = arith.constant 0 : index
    %12 = vector.load %arg4[%c0_6, %c0_7] : memref<20x10xbf16, #tpu.memory_space<vmem>>, vector<20x10xbf16>
    %cst_8 = arith.constant dense<0.000000e+00> : vector<128x10xf32>
    %13 = tpu.matmul %11, %12, %cst_8 {dimension_numbers = #tpu.dot_dimension_numbers<[1], [0], [0], [1], [0, 0, 1, 1], [], []>} : vector<128x20xbf16>, vector<20x10xbf16>, vector<128x10xf32> -> vector<128x10xf32>
    %c0_9 = arith.constant 0 : index
    %c0_10 = arith.constant 0 : index
    %14 = vector.load %arg5[%c0_9, %c0_10] : memref<1x10xf32, #tpu.memory_space<vmem>>, vector<1x10xf32>
    %15 = vector.broadcast %14 : vector<1x10xf32> to vector<128x10xf32>
    %16 = arith.addf %13, %15 : vector<128x10xf32>
    %17 = arith.negf %16 : vector<128x10xf32>
    %18 = math.exp %17 : vector<128x10xf32>
    %cst_11 = arith.constant 1.000000e+00 : f32
    %19 = vector.broadcast %cst_11 : f32 to vector<128x10xf32>
    %20 = arith.addf %19, %18 : vector<128x10xf32>
    %21 = arith.divf %19, %20 : vector<128x10xf32>
    %22 = arith.truncf %21 : vector<128x10xf32> to vector<128x10xbf16>
    %c0_12 = arith.constant 0 : index
    %c0_13 = arith.constant 0 : index
    %23 = vector.load %arg6[%c0_12, %c0_13] : memref<10x20xbf16, #tpu.memory_space<vmem>>, vector<10x20xbf16>
    %cst_14 = arith.constant dense<0.000000e+00> : vector<128x20xf32>
    %24 = tpu.matmul %22, %23, %cst_14 {dimension_numbers = #tpu.dot_dimension_numbers<[1], [0], [0], [1], [0, 0, 1, 1], [], []>} : vector<128x10xbf16>, vector<10x20xbf16>, vector<128x20xf32> -> vector<128x20xf32>
    %c0_15 = arith.constant 0 : index
    %c0_16 = arith.constant 0 : index
    %25 = vector.load %arg7[%c0_15, %c0_16] : memref<1x20xf32, #tpu.memory_space<vmem>>, vector<1x20xf32>
    %26 = vector.broadcast %25 : vector<1x20xf32> to vector<128x20xf32>
    %27 = arith.addf %24, %26 : vector<128x20xf32>
    %28 = arith.negf %27 : vector<128x20xf32>
    %29 = math.exp %28 : vector<128x20xf32>
    %cst_17 = arith.constant 1.000000e+00 : f32
    %30 = vector.broadcast %cst_17 : f32 to vector<128x20xf32>
    %31 = arith.addf %30, %29 : vector<128x20xf32>
    %32 = arith.divf %30, %31 : vector<128x20xf32>
    %33 = arith.truncf %32 : vector<128x20xf32> to vector<128x20xbf16>
    %c0_18 = arith.constant 0 : index
    %c0_19 = arith.constant 0 : index
    %34 = vector.load %arg8[%c0_18, %c0_19] : memref<20x256xbf16, #tpu.memory_space<vmem>>, vector<20x256xbf16>
    %cst_20 = arith.constant dense<0.000000e+00> : vector<128x256xf32>
    %35 = tpu.matmul %33, %34, %cst_20 {dimension_numbers = #tpu.dot_dimension_numbers<[1], [0], [0], [1], [0, 0, 1, 1], [], []>} : vector<128x20xbf16>, vector<20x256xbf16>, vector<128x256xf32> -> vector<128x256xf32>
    %c0_21 = arith.constant 0 : index
    %c0_22 = arith.constant 0 : index
    %36 = vector.load %arg9[%c0_21, %c0_22] : memref<1x256xf32, #tpu.memory_space<vmem>>, vector<1x256xf32>
    %37 = vector.broadcast %36 : vector<1x256xf32> to vector<128x256xf32>
    %38 = arith.addf %35, %37 : vector<128x256xf32>
    %39 = arith.truncf %38 : vector<128x256xf32> to vector<128x256xbf16>
    %c0_23 = arith.constant 0 : index
    %c0_24 = arith.constant 0 : index
    %40 = vector.load %arg10[%c0_23, %c0_24] : memref<128x256xbf16, #tpu.memory_space<vmem>>, vector<128x256xbf16>
    tpu.vector_store %arg10[%c0_23, %c0_24], %39 {strides = array<i32>} : memref<128x256xbf16, #tpu.memory_space<vmem>>, vector<128x256xbf16>,
    return
  }
  func.func @transform_0(%arg0: i32) -> (i32, i32) {
    %c0_i32 = arith.constant 0 : i32
    %c0_i32_0 = arith.constant 0 : i32
    return %arg0, %c0_i32 : i32, i32
  }
  func.func @transform_1(%arg0: i32) -> (i32, i32) {
    %c0_i32 = arith.constant 0 : i32
    %c0_i32_0 = arith.constant 0 : i32
    %c0_i32_1 = arith.constant 0 : i32
    return %c0_i32, %c0_i32_0 : i32, i32
  }
  func.func @transform_2(%arg0: i32) -> (i32, i32) {
    %c0_i32 = arith.constant 0 : i32
    %c0_i32_0 = arith.constant 0 : i32
    %c0_i32_1 = arith.constant 0 : i32
    return %c0_i32, %c0_i32_0 : i32, i32
  }
  func.func @transform_3(%arg0: i32) -> (i32, i32) {
    %c0_i32 = arith.constant 0 : i32
    %c0_i32_0 = arith.constant 0 : i32
    %c0_i32_1 = arith.constant 0 : i32
    return %c0_i32, %c0_i32_0 : i32, i32
  }
  func.func @transform_4(%arg0: i32) -> (i32, i32) {
    %c0_i32 = arith.constant 0 : i32
    %c0_i32_0 = arith.constant 0 : i32
    %c0_i32_1 = arith.constant 0 : i32
    return %c0_i32, %c0_i32_0 : i32, i32
  }
  func.func @transform_5(%arg0: i32) -> (i32, i32) {
    %c0_i32 = arith.constant 0 : i32
    %c0_i32_0 = arith.constant 0 : i32
    %c0_i32_1 = arith.constant 0 : i32
    return %c0_i32, %c0_i32_0 : i32, i32
  }
  func.func @transform_6(%arg0: i32) -> (i32, i32) {
    %c0_i32 = arith.constant 0 : i32
    %c0_i32_0 = arith.constant 0 : i32
    %c0_i32_1 = arith.constant 0 : i32
    return %c0_i32, %c0_i32_0 : i32, i32
  }
  func.func @transform_7(%arg0: i32) -> (i32, i32) {
    %c0_i32 = arith.constant 0 : i32
    %c0_i32_0 = arith.constant 0 : i32
    %c0_i32_1 = arith.constant 0 : i32
    return %c0_i32, %c0_i32_0 : i32, i32
  }
  func.func @transform_8(%arg0: i32) -> (i32, i32) {
    %c0_i32 = arith.constant 0 : i32
    %c0_i32_0 = arith.constant 0 : i32
    %c0_i32_1 = arith.constant 0 : i32
    return %c0_i32, %c0_i32_0 : i32, i32
  }
  func.func @transform_9(%arg0: i32) -> (i32, i32) {
    %c0_i32 = arith.constant 0 : i32
    %c0_i32_0 = arith.constant 0 : i32
    return %arg0, %c0_i32 : i32, i32
  }
}

</mosaic_0001>

<bundles_post_ra>
// kernel: autoencoder_forward.1
= control target key start
LH: loop header
LB: loop body
LE: loop exit
PB: predicated region body
PF: predicated region fallthrough
CT: control target
= control target key end

     0   :  { %14 = vsyncpa [#allocation3], 0  ;;  %s2719_s0 = inlined_call_operand.vmem [shape: bf16[300,256], index: 0, kind: input, shape index: {}]   ;;  %s2720_s1 = inlined_call_operand.vmem [shape: bf16[256,20], index: 1, kind: input, shape index: {}]   ;;  %s2721_s2 = inlined_call_operand.vmem [shape: f32[1,20], index: 2, kind: input, shape index: {}]   ;;  %s2722_s3 = inlined_call_operand.vmem [shape: bf16[20,10], index: 3, kind: input, shape index: {}]   ;;  %s2723_s4 = inlined_call_operand.vmem [shape: f32[1,10], index: 4, kind: input, shape index: {}]   ;;  %s2724_s5 = inlined_call_operand.vmem [shape: bf16[10,20], index: 5, kind: input, shape index: {}]   ;;  %s2725_s6 = inlined_call_operand.vmem [shape: f32[1,20], index: 6, kind: input, shape index: {}]   ;;  %s2726_s7 = inlined_call_operand.vmem [shape: bf16[20,256], index: 7, kind: input, shape index: {}]   ;;  %s2727_s8 = inlined_call_operand.vmem [shape: f32[1,256], index: 8, kind: input, shape index: {}]   ;;  %s2728_s9 = inlined_call_operand.hbm [shape: bf16[300,256], index: 9, kind: output, shape index: {}]  }
   0x1   :  { %16 = vsyncpa [#allocation3 + $0x1], 0  ;;  %s2357_s30 = smov 0   ;;  %s2359_s10 = smov 0  }
   0x2   :  { %s2361_s11 = smov 0   ;;  %s2363_s12 = smov 0  }
   0x3 LB: > { %s2378_s13 = sadd.s32 4294967295, %s2301_s12   ;;  %s1662_s14 = sadd.s32 4294967294, %s2301_s12   ;;  %s2301_s12 = sphi %s2363_s12, %s2734_s12   ;;  %s2297_s11 = sphi %s2361_s11, %s2733_s11   ;;  %s2293_s10 = sphi %s2359_s10, %s2732_s10   ;;  %s2289_s30 = sphi %s2357_s30, %s2731_s30  }
   0x4   : > { %s2382_s15 = sadd.s32 1, %s2301_s12   ;;  %s223_s16 = sadd.s32 1, %s2297_s11 }
   0x5   : > { %s220_s17 = ssub.s32 %s2301_s12, %s2382_s15  ;;  %p233_p0 = scmp.ne.s32.totalorder %s2297_s11, %s2293_s10 }
   0x6   : > { %p221_p1 = scmp.eq.s32.totalorder %s220_s17, 0  ;;  %p234_p2 = scmp.eq.s32.totalorder %s2378_s13, 2 }
   0x7   : > { %p239_p3 = scmp.ne.s32.totalorder %s2293_s10, %s2289_s30  ;;  %p240_p4 = scmp.eq.s32.totalorder %s1662_s14, 2 }
   0x8   : > { %s2393_s18 = scalar_select %p221_p1, %s2297_s11, %s223_s16  }
   0x9   : > { %p2395_p5 = por %p234_p2, %p233_p0  ;;  %p2399_p6 = por %p240_p4, %p239_p3 }
   0xa   : > { %p1665_p7 = scmp.ge.s32.totalorder %s2301_s12, 1  ;;  %p302_p8 = scmp.lt.s32.totalorder %s2301_s12, 4 }
   0xc   : > { %p303_p9 = pnand %p1665_p7, %p302_p8 }
   0xd   : > { %s2409_s23 = sshll.u32 (!%p303_p9), %s2378_s13, 4  ;;  %s341_s24 = sand.u32 (!%p303_p9), 1, %s2293_s10  }
   0xe   : > { %306 = sbr.rel (%p303_p9) target bundleno = 1056 (0x420), region = 56  ;;  %p350_p10 = scmp.lt.s32.totalorder (!%p303_p9), %s2409_s23, 37 }
   0xf   : > { %s1666_s27 = sshll.u32 (!%p303_p9), %s341_s24, 7  ;;  %s2659_s29 = scalar_lea.sflag (!%p303_p9), [#allocation3], %s341_s24 }
  0x13   : > { %v2001_v0 = vld [vmem:[%s2720_s1 + $0x78] sm:$0xff]   ;;  %v2003_v2 = vld [vmem:[%s2720_s1 + $0x70] sm:$0xff]   ;;  %v2005_v4 = vld [vmem:[%s2720_s1 + $0x68] sm:$0xff]   ;;  %s351_s22 = scalar_select %p350_p10, %s2409_s23, 37  ;;  %vm844_vm0 = vcmask 1041408   ;;  %vm819_vm1 = vcmask 162816  }
  0x14   : > { %v2002_v1 = vld [vmem:[%s2720_s1 + $0x38] sm:$0xff]   ;;  %1832 = vmatprep.subr.bf16.mxu0 %v2001_v0  ;;  %v2004_v3 = vld [vmem:[%s2720_s1 + $0x30] sm:$0xff]   ;;  %v2006_v5 = vld [vmem:[%s2720_s1 + $0x28] sm:$0xff]   ;;  %vm1088_vm2 = vcmask 1044480   ;;  %vm1063_vm3 = vcmask 80896  }
  0x15   : > { %1833 = vmatpush3.bf16.msra.mxu0 %v2002_v1  ;;  %v2007_v6 = vld [vmem:[%s2720_s1 + $0x60] sm:$0xff]   ;;  %s1812_s28 = sshll.u32 %s351_s22, 3  ;;  %v2009_v8 = vld [vmem:[%s2720_s1 + $0x58] sm:$0xff]   ;;  %v2011_v10 = vld [vmem:[%s2720_s1 + $0x50] sm:$0xff]   ;;  %s2609_s22 = scalar_lea.vmem [#allocation2], %s1666_s27 }
  0x16   : > { %1834 = vmatprep.subr.bf16.mxu0 %v2003_v2  ;;  %v2008_v7 = vld [vmem:[%s2720_s1 + $0x20] sm:$0xff]   ;;  %s2440_s21 = scalar_lea.vmem %s2719_s0, %s1812_s28  ;;  %v2010_v9 = vld [vmem:[%s2720_s1 + $0x18] sm:$0xff]   ;;  %v2012_v12 = vld [vmem:[%s2720_s1 + $0x10] sm:$0xff]   ;;  %s1587_s28 = ssub.s32 (%p2395_p5), 38, %s2409_s23 }
  0x17   : > { %v2019_v11 = vld [vmem:[%s2440_s21 + $0x4] ss:$8 sps:$4 sm:$0xff]   ;;  %v2041_v17 = vld [vmem:[%s2722_s3 + $0x8] ss:$0 sps:$4 sm:$0x33]   ;;  %p1588_p11 = scmp.lt.s32.totalorder (%p2395_p5), %s1587_s28, 16 }
  0x18   : > { %631 = vmatprep.mubr.bf16.mxu0 %v2019_v11  ;;  %v2013_v13 = vld [vmem:[%s2720_s1 + $0x48] sm:$0xff]   ;;  %v2015_v15 = vld [vmem:[%s2720_s1 + $0x40] sm:$0xff]   ;;  %v846_v18 = vsel %vm844_vm0, %v2041_v17, 0  ;;  %1958 = vmatprep.subr.msk.bf16.mxu1 %vm844_vm0, %v2041_v17  ;;  %v2020_v20 = vld [vmem:[%s2440_s21 + $0x14] ss:$8 sps:$4 sm:$0xff]  }
  0x19   : > { %1835 = vmatpush3.bf16.msra.mxu0 %v2004_v3  ;;  %v2014_v14 = vld [vmem:[%s2720_s1 + $0x8] sm:$0xff]   ;;  %v2016_v16 = vld [vmem:[%s2720_s1] sm:$0xff]   ;;  %1955 = vmatpush3.bf16.msra.mxu1 %v846_v18  ;;  %v2022_v21 = vld [vmem:[%s2440_s21 + $0x10] ss:$8 sps:$4 sm:$0xff]  }
  0x1a   : > { %1836 = vmatprep.subr.bf16.mxu0 %v2005_v4  ;;  %v2017_v19 = vld [vmem:[%s2440_s21] ss:$8 sps:$4 sm:$0xff]   ;;  %v2023_v22 = vld [vmem:[%s2440_s21 + $0x24] ss:$8 sps:$4 sm:$0xff]   ;;  %v2026_v24 = vld [vmem:[%s2440_s21 + $0x34] ss:$8 sps:$4 sm:$0xff]  }
  0x1b   : > { %v2025_v23 = vld [vmem:[%s2440_s21 + $0x20] ss:$8 sps:$4 sm:$0xff]   ;;  %v2028_v25 = vld [vmem:[%s2440_s21 + $0x30] ss:$8 sps:$4 sm:$0xff]   ;;  %v2029_v26 = vld [vmem:[%s2440_s21 + $0x44] ss:$8 sps:$4 sm:$0xff]  }
  0x1c   : > { %v2031_v27 = vld [vmem:[%s2440_s21 + $0x40] ss:$8 sps:$4 sm:$0xff]   ;;  %v2032_v28 = vld [vmem:[%s2440_s21 + $0x54] ss:$8 sps:$4 sm:$0xff]   ;;  %v2034_v29 = vld [vmem:[%s2440_s21 + $0x50] ss:$8 sps:$4 sm:$0xff]  }
  0x1d   : > { %1837 = vmatpush3.bf16.msra.mxu0 %v2006_v5  ;;  %v2035_v30 = vld [vmem:[%s2440_s21 + $0x64] ss:$8 sps:$4 sm:$0xff]   ;;  %v2037_v31 = vld [vmem:[%s2440_s21 + $0x60] ss:$8 sps:$4 sm:$0xff]   ;;  %v2038_v32 = vld [vmem:[%s2440_s21 + $0x74] ss:$8 sps:$4 sm:$0xff]  }
  0x1e   : > { %1838 = vmatprep.subr.bf16.mxu0 %v2007_v6  ;;  %v2040_v33 = vld [vmem:[%s2440_s21 + $0x70] ss:$8 sps:$4 sm:$0xff]   ;;  %v2042_v34 = vld [vmem:[%s2722_s3] sm:$0xff]  }
  0x1f   : > { %1954 = vmatprep.subr.bf16.mxu1 %v2042_v34  ;;  %v2491_v36 = vld [vmem:[%s2721_s2] ss:$0 sm:$0xff] }
  0x20   : > { %1956 = vmatpush3.bf16.msra.mxu1 %v2042_v34 }
  0x21   : > { %1839 = vmatpush3.bf16.msra.mxu0 %v2008_v7 }
  0x22   : > { %1840 = vmatprep.subr.bf16.mxu0 %v2009_v8 }
  0x25   : > { %1841 = vmatpush3.bf16.msra.mxu0 %v2010_v9 }
  0x26   : > { %1842 = vmatprep.subr.bf16.mxu0 %v2011_v10 }
  0x29   : > { %1843 = vmatpush3.bf16.msra.mxu0 %v2012_v12 }
  0x2a   : > { %1844 = vmatprep.subr.bf16.mxu0 %v2013_v13 }
  0x2d   : > { %1845 = vmatpush3.bf16.msra.mxu0 %v2014_v14 }
  0x2e   : > { %1846 = vmatprep.subr.bf16.mxu0 %v2015_v15 }
  0x31   : > { %1847 = vmatpush3.bf16.msra.mxu0 %v2016_v16 }
  0x32   : > { %1957 = vmatprep.subr.msk.bf16.mxu0 %vm844_vm0, %v2041_v17 }
  0x34   : > { %632 = vmatmul.mubr.bf16.vlgmr.msra.gmra.mxu0 %v2017_v19 }
  0x35   : > { %639 = vmatprep.mubr.bf16.mxu0 %v2020_v20  ;;  %1916 = vmatpush3.bf16.msra.mxu0 %v846_v18 }
  0x36   : > { %1917 = vmatprep.subr.bf16.mxu0 %v2042_v34 }
  0x39   : > { %1918 = vmatpush3.bf16.msra.mxu0 %v2042_v34 }
  0x3c   : > { %640 = vmatmul.mubr.bf16.gmra.mxu0 %v2022_v21 }
  0x3d   : > { %647 = vmatprep.mubr.bf16.mxu0 %v2023_v22 }
  0x44   : > { %648 = vmatmul.mubr.bf16.gmra.mxu0 %v2025_v23 }
  0x45   : > { %655 = vmatprep.mubr.bf16.mxu0 %v2026_v24 }
  0x4c   : > { %656 = vmatmul.mubr.bf16.gmra.mxu0 %v2028_v25 }
  0x4d   : > { %663 = vmatprep.mubr.bf16.mxu0 %v2029_v26 }
  0x54   : > { %664 = vmatmul.mubr.bf16.gmra.mxu0 %v2031_v27 }
  0x55   : > { %671 = vmatprep.mubr.bf16.mxu0 %v2032_v28 }
  0x5c   : > { %672 = vmatmul.mubr.bf16.gmra.mxu0 %v2034_v29 }
  0x5d   : > { %679 = vmatprep.mubr.bf16.mxu0 %v2035_v30 }
  0x64   : > { %680 = vmatmul.mubr.bf16.gmra.mxu0 %v2037_v31 }
  0x65   : > { %687 = vmatprep.mubr.bf16.mxu0 %v2038_v32 }
  0x6c   : > { %688 = vmatmul.mubr.bf16.gmra.mxu0 %v2040_v33 }
  0xf4   : > { %v1848_v35 = vpop.f32.mrf.mxu0 }
  0xf6   : > { %v1849_v37 = vpop.f32.mrf.mxu0 }
  0xf7   : > { %v1850_v38 = vadd.f32 %v1849_v37, %v1848_v35 }
  0xf8   : > { %v1851_v39 = vpop.f32.mrf.mxu0 }
  0xf9   : > { %v634_v40 = vadd.f32 %v1850_v38, %v2491_v36 }
  0xfa   : > { %v1852_v41 = vpop.f32.mrf.mxu0 }
  0xfb   : > { %v1703_v42 = vmul.f32 -1.442695, %v634_v40  ;;  %v1853_v43 = vadd.f32 %v1852_v41, %v1851_v39 }
  0xfc   : > { %v1854_v44 = vpop.f32.mrf.mxu0 }
  0xfd   : > { %2049 = vpow2.f32 %v1703_v42  ;;  %v637_v45 = vadd.f32 %v1853_v43, %v2491_v36 }
  0xfe   : > { %v1855_v46 = vpop.f32.mrf.mxu0 }
  0xff   : > { %v1704_v47 = vmul.f32 -1.442695, %v637_v45  ;;  %v1856_v48 = vadd.f32 %v1855_v46, %v1854_v44 }
 0x100   : > { %v1857_v49 = vpop.f32.mrf.mxu0 }
 0x101   : > { %2051 = vpow2.f32 %v1704_v47  ;;  %v642_v50 = vadd.f32 %v1856_v48, %v2491_v36 }
 0x102   : > { %v1858_v51 = vpop.f32.mrf.mxu0 }
 0x103   : > { %v1705_v52 = vmul.f32 -1.442695, %v642_v50  ;;  %v1859_v53 = vadd.f32 %v1858_v51, %v1857_v49 }
 0x104   : > { %v1860_v54 = vpop.f32.mrf.mxu0 }
 0x105   : > { %2053 = vpow2.f32 %v1705_v52  ;;  %v645_v55 = vadd.f32 %v1859_v53, %v2491_v36 }
 0x106   : > { %v1861_v56 = vpop.f32.mrf.mxu0 }
 0x107   : > { %v1706_v57 = vmul.f32 -1.442695, %v645_v55  ;;  %v1862_v58 = vadd.f32 %v1861_v56, %v1860_v54 }
 0x108   : > { %v1863_v59 = vpop.f32.mrf.mxu0 }
 0x109   : > { %2055 = vpow2.f32 %v1706_v57  ;;  %v650_v60 = vadd.f32 %v1862_v58, %v2491_v36 }
 0x10a   : > { %v2050_v61 = vpop.eup %2049  ;;  %v1864_v62 = vpop.f32.mrf.mxu0 }
 0x10b   : > { %v1707_v63 = vmul.f32 -1.442695, %v650_v60  ;;  %v1865_v0 = vadd.f32 %v1864_v62, %v1863_v59  ;;  %v744_v1 = vadd.f32 1.0, %v2050_v61 }
 0x10c   : > { %v1866_v2 = vpop.f32.mrf.mxu0 }
 0x10d   : > { %v653_v3 = vadd.f32 %v1865_v0, %v2491_v36  ;;  %2057 = vpow2.f32 %v1707_v63 }
 0x10e   : > { %v2052_v4 = vpop.eup %2051  ;;  %v1867_v5 = vpop.f32.mrf.mxu0  ;;  %2059 = vrcp.f32 %v744_v1 }
 0x10f   : > { %v745_v6 = vadd.f32 1.0, %v2052_v4  ;;  %v1708_v7 = vmul.f32 -1.442695, %v653_v3  ;;  %v1868_v8 = vadd.f32 %v1867_v5, %v1866_v2 }
 0x110   : > { %v1869_v9 = vpop.f32.mrf.mxu0 }
 0x111   : > { %2061 = vrcp.f32 %v745_v6  ;;  %v658_v10 = vadd.f32 %v1868_v8, %v2491_v36 }
 0x112   : > { %v2054_v11 = vpop.eup %2053  ;;  %2063 = vpow2.f32 %v1708_v7  ;;  %v1870_v12 = vpop.f32.mrf.mxu0 }
 0x113   : > { %v1709_v13 = vmul.f32 -1.442695, %v658_v10  ;;  %v1871_v14 = vadd.f32 %v1870_v12, %v1869_v9  ;;  %v746_v15 = vadd.f32 1.0, %v2054_v11 }
 0x114   : > { %v1872_v16 = vpop.f32.mrf.mxu0 }
 0x115   : > { %v661_v17 = vadd.f32 %v1871_v14, %v2491_v36  ;;  %2065 = vpow2.f32 %v1709_v13 }
 0x116   : > { %v2056_v18 = vpop.eup %2055  ;;  %v1873_v19 = vpop.f32.mrf.mxu0  ;;  %2067 = vrcp.f32 %v746_v15 }
 0x117   : > { %v747_v20 = vadd.f32 1.0, %v2056_v18  ;;  %v1710_v21 = vmul.f32 -1.442695, %v661_v17  ;;  %v1874_v22 = vadd.f32 %v1873_v19, %v1872_v16 }
 0x118   : > { %v1875_v23 = vpop.f32.mrf.mxu0 }
 0x119   : > { %2069 = vrcp.f32 %v747_v20  ;;  %v666_v24 = vadd.f32 %v1874_v22, %v2491_v36 }
 0x11a   : > { %2071 = vpow2.f32 %v1710_v21  ;;  %v1876_v25 = vpop.f32.mrf.mxu0  ;;  %v2058_v26 = vpop.eup %2057 }
 0x11b   : > { %v1711_v27 = vmul.f32 -1.442695, %v666_v24  ;;  %v1877_v28 = vadd.f32 %v1876_v25, %v1875_v23  ;;  %v748_v29 = vadd.f32 1.0, %v2058_v26  ;;  %v2060_v31 = vpop.eup %2059 }
 0x11c   : > { %v1878_v30 = vpop.f32.mrf.mxu0 }
 0x11d   : > { %2073 = vpow2.f32 %v1711_v27  ;;  %v669_v32 = vadd.f32 %v1877_v28, %v2491_v36 }
 0x11e   : > { %v2062_v33 = vpop.eup %2061  ;;  %v1879_v34 = vpop.f32.mrf.mxu0  ;;  %2075 = vrcp.f32 %v748_v29 }
 0x11f   : > { %v2064_v35 = vpop.eup %2063  ;;  %v1712_v37 = vmul.f32 -1.442695, %v669_v32  ;;  %v1880_v38 = vadd.f32 %v1879_v34, %v1878_v30  ;;  %v792_v39 = vpack.c.bf16 %v2062_v33, %v2060_v31 }
 0x120   : > { %v749_v40 = vadd.f32 1.0, %v2064_v35  ;;  %v1881_v41 = vpop.f32.mrf.mxu0 }
 0x121   : > { %2077 = vpow2.f32 %v1712_v37  ;;  %v674_v42 = vadd.f32 %v1880_v38, %v2491_v36  ;;  %1919 = vmatprep.mubr.msk.bf16.mxu0 %vm819_vm1, %v792_v39 }
 0x122   : > { %2079 = vrcp.f32 %v749_v40  ;;  %v1882_v43 = vpop.f32.mrf.mxu0  ;;  %v2066_v44 = vpop.eup %2065 }
 0x123   : > { %v1713_v45 = vmul.f32 -1.442695, %v674_v42  ;;  %v1883_v46 = vadd.f32 %v1882_v43, %v1881_v41  ;;  %v750_v47 = vadd.f32 1.0, %v2066_v44  ;;  %v2068_v49 = vpop.eup %2067 }
 0x124   : > { %v1884_v48 = vpop.f32.mrf.mxu0 }
 0x125   : > { %2081 = vpow2.f32 %v1713_v45  ;;  %v677_v50 = vadd.f32 %v1883_v46, %v2491_v36  ;;  %v2043_v45 = vld [vmem:[%s2724_s5] sm:$0x1f]  }
 0x126   : > { %v2070_v51 = vpop.eup %2069  ;;  %v1885_v52 = vpop.f32.mrf.mxu0  ;;  %2083 = vrcp.f32 %v750_v47  ;;  %1959 = vmatprep.subr.msk.bf16.mxu1 %vm1088_vm2, %v2043_v45  ;;  %v1090_v46 = vsel %vm1088_vm2, %v2043_v45, 0  ;;  %v2523_v47 = vld [vmem:[%s2723_s4] ss:$0 sm:$0xff] }
 0x127   : > { %v2072_v53 = vpop.eup %2071  ;;  %v1714_v54 = vmul.f32 -1.442695, %v677_v50  ;;  %v1886_v55 = vadd.f32 %v1885_v52, %v1884_v48  ;;  %v793_v56 = vpack.c.bf16 %v2070_v51, %v2068_v49 }
 0x128   : > { %v751_v57 = vadd.f32 1.0, %v2072_v53  ;;  %v1887_v58 = vpop.f32.mrf.mxu0 }
 0x129   : > { %2085 = vpow2.f32 %v1714_v54  ;;  %v682_v59 = vadd.f32 %v1886_v55, %v2491_v36  ;;  %1920 = vmatmul.mubr.msk.bf16.vlgmr.msra.gmra.mxu0 %vm819_vm1, %v793_v56 }
 0x12a   : > { %v2074_v60 = vpop.eup %2073  ;;  %2087 = vrcp.f32 %v751_v57  ;;  %v1888_v61 = vpop.f32.mrf.mxu0 }
 0x12b   : > { %v1715_v62 = vmul.f32 -1.442695, %v682_v59  ;;  %v1889_v63 = vadd.f32 %v1888_v61, %v1887_v58  ;;  %v752_v0 = vadd.f32 1.0, %v2074_v60  ;;  %v2076_v2 = vpop.eup %2075 }
 0x12c   : > { %v1890_v1 = vpop.f32.mrf.mxu0 }
 0x12d   : > { %v685_v3 = vadd.f32 %v1889_v63, %v2491_v36  ;;  %2089 = vpow2.f32 %v1715_v62 }
 0x12e   : > { %v2078_v4 = vpop.eup %2077  ;;  %v1891_v5 = vpop.f32.mrf.mxu0  ;;  %2091 = vrcp.f32 %v752_v0 }
 0x12f   : > { %v2080_v6 = vpop.eup %2079  ;;  %v753_v7 = vadd.f32 1.0, %v2078_v4  ;;  %v1716_v8 = vmul.f32 -1.442695, %v685_v3  ;;  %v1892_v9 = vadd.f32 %v1891_v5, %v1890_v1 }
 0x130   : > { %v1893_v10 = vpop.f32.mrf.mxu0  ;;  %v794_v11 = vpack.c.bf16 %v2080_v6, %v2076_v2 }
 0x131   : > { %2093 = vrcp.f32 %v753_v7  ;;  %v690_v12 = vadd.f32 %v1892_v9, %v2491_v36 }
 0x132   : > { %v2082_v13 = vpop.eup %2081  ;;  %2095 = vpow2.f32 %v1716_v8  ;;  %1923 = vmatprep.mubr.msk.bf16.mxu0 %vm819_vm1, %v794_v11  ;;  %v1894_v14 = vpop.f32.mrf.mxu0 }
 0x133   : > { %v1717_v15 = vmul.f32 -1.442695, %v690_v12  ;;  %v1895_v16 = vadd.f32 %v1894_v14, %v1893_v10  ;;  %v754_v17 = vadd.f32 1.0, %v2082_v13  ;;  %v2084_v18 = vpop.eup %2083 }
 0x135   : > { %v693_v19 = vadd.f32 %v1895_v16, %v2491_v36  ;;  %2097 = vpow2.f32 %v1717_v15 }
 0x136   : > { %v2086_v20 = vpop.eup %2085  ;;  %2099 = vrcp.f32 %v754_v17 }
 0x137   : > { %v2088_v21 = vpop.eup %2087  ;;  %v755_v22 = vadd.f32 1.0, %v2086_v20  ;;  %v1718_v23 = vmul.f32 -1.442695, %v693_v19 }
 0x138   : > { %v795_v24 = vpack.c.bf16 %v2088_v21, %v2084_v18 }
 0x139   : > { %2101 = vrcp.f32 %v755_v22 }
 0x13a   : > { %2103 = vpow2.f32 %v1718_v23  ;;  %1924 = vmatmul.mubr.msk.bf16.gmra.mxu0 %vm819_vm1, %v795_v24  ;;  %v2090_v25 = vpop.eup %2089 }
 0x13b   : > { %v2092_v26 = vpop.eup %2091  ;;  %v756_v27 = vadd.f32 1.0, %v2090_v25 }
 0x13d   : > { %2105 = vrcp.f32 %v756_v27 }
 0x13e   : > { %v2094_v28 = vpop.eup %2093 }
 0x13f   : > { %v2096_v29 = vpop.eup %2095  ;;  %v796_v30 = vpack.c.bf16 %v2094_v28, %v2092_v26 }
 0x140   : > { %v757_v31 = vadd.f32 1.0, %v2096_v29 }
 0x141   : > { %1927 = vmatprep.mubr.msk.bf16.mxu0 %vm819_vm1, %v796_v30 }
 0x142   : > { %2107 = vrcp.f32 %v757_v31  ;;  %v2098_v36 = vpop.eup %2097 }
 0x143   : > { %v2100_v32 = vpop.eup %2099  ;;  %v758_v33 = vadd.f32 1.0, %v2098_v36 }
 0x145   : > { %2109 = vrcp.f32 %v758_v33 }
 0x146   : > { %v2102_v34 = vpop.eup %2101 }
 0x147   : > { %v2104_v35 = vpop.eup %2103  ;;  %v797_v37 = vpack.c.bf16 %v2102_v34, %v2100_v32 }
 0x148   : > { %v759_v38 = vadd.f32 1.0, %v2104_v35 }
 0x149   : > { %1928 = vmatmul.mubr.msk.bf16.gmra.mxu0 %vm819_vm1, %v797_v37 }
 0x14a   : > { %2111 = vrcp.f32 %v759_v38  ;;  %v2106_v39 = vpop.eup %2105 }
 0x14f   : > { %v2108_v40 = vpop.eup %2107 }
 0x150   : > { %v798_v41 = vpack.c.bf16 %v2108_v40, %v2106_v39 }
 0x152   : > { %1931 = vmatprep.mubr.msk.bf16.mxu1 %vm819_vm1, %v798_v41  ;;  %v2110_v42 = vpop.eup %2109 }
 0x157   : > { %v2112_v43 = vpop.eup %2111 }
 0x158   : > { %v799_v44 = vpack.c.bf16 %v2112_v43, %v2110_v42 }
 0x15a   : > { %1932 = vmatmul.mubr.msk.bf16.vlgmr.msra.gmra.mxu1 %vm819_vm1, %v799_v44 }
 0x15b   : > { %1936 = vmatpush3.bf16.msra.mxu1 %v1090_v46 }
 0x1e9   : > { %v1921_v48 = vpop.f32.mrf.mxu0 }
 0x1ea   : > { %v891_v49 = vadd.f32 %v1921_v48, %v2523_v47 }
 0x1eb   : > { %v882_v50 = vpop.f32.mrf.mxu0 }
 0x1ec   : > { %v1732_v51 = vmul.f32 -1.442695, %v891_v49  ;;  %v883_v52 = vadd.f32 %v2523_v47, %v882_v50 }
 0x1ed   : > { %v1922_v53 = vpop.f32.mrf.mxu0 }
 0x1ee   : > { %2113 = vpow2.f32 %v1732_v51  ;;  %v1730_v54 = vmul.f32 -1.442695, %v883_v52  ;;  %v894_v55 = vadd.f32 %v1922_v53, %v2523_v47 }
 0x1ef   : > { %v885_v56 = vpop.f32.mrf.mxu0 }
 0x1f0   : > { %2115 = vpow2.f32 %v1730_v54  ;;  %v1733_v57 = vmul.f32 -1.442695, %v894_v55  ;;  %v886_v58 = vadd.f32 %v2523_v47, %v885_v56 }
 0x1f2   : > { %2117 = vpow2.f32 %v1733_v57  ;;  %v1731_v59 = vmul.f32 -1.442695, %v886_v58 }
 0x1f4   : > { %2119 = vpow2.f32 %v1731_v59 }
 0x1fa   : > { %v1925_v60 = vpop.f32.mrf.mxu0 }
 0x1fb   : > { %v2114_v61 = vpop.eup %2113  ;;  %v907_v62 = vadd.f32 %v1925_v60, %v2523_v47 }
 0x1fc   : > { %v995_v63 = vadd.f32 1.0, %v2114_v61  ;;  %v898_v0 = vpop.f32.mrf.mxu0 }
 0x1fd   : > { %v2116_v1 = vpop.eup %2115  ;;  %v1736_v2 = vmul.f32 -1.442695, %v907_v62  ;;  %v899_v3 = vadd.f32 %v2523_v47, %v898_v0 }
 0x1fe   : > { %2121 = vrcp.f32 %v995_v63  ;;  %v993_v4 = vadd.f32 1.0, %v2116_v1  ;;  %v1926_v5 = vpop.f32.mrf.mxu0 }
 0x1ff   : > { %v2118_v6 = vpop.eup %2117  ;;  %2123 = vpow2.f32 %v1736_v2  ;;  %v1734_v7 = vmul.f32 -1.442695, %v899_v3  ;;  %v910_v8 = vadd.f32 %v1926_v5, %v2523_v47 }
 0x200   : > { %2125 = vrcp.f32 %v993_v4  ;;  %v996_v9 = vadd.f32 1.0, %v2118_v6  ;;  %v901_v10 = vpop.f32.mrf.mxu0 }
 0x201   : > { %v2120_v11 = vpop.eup %2119  ;;  %2127 = vpow2.f32 %v1734_v7  ;;  %v1737_v12 = vmul.f32 -1.442695, %v910_v8  ;;  %v902_v13 = vadd.f32 %v2523_v47, %v901_v10 }
 0x202   : > { %2129 = vrcp.f32 %v996_v9  ;;  %v994_v14 = vadd.f32 1.0, %v2120_v11 }
 0x203   : > { %2131 = vpow2.f32 %v1737_v12  ;;  %v1735_v15 = vmul.f32 -1.442695, %v902_v13 }
 0x204   : > { %2133 = vrcp.f32 %v994_v14 }
 0x205   : > { %2135 = vpow2.f32 %v1735_v15 }
 0x209   : > { %v1929_v16 = vpop.f32.mrf.mxu0 }
 0x20a   : > { %v923_v17 = vadd.f32 %v1929_v16, %v2523_v47 }
 0x20b   : > { %v2122_v18 = vpop.eup %2121  ;;  %v914_v19 = vpop.f32.mrf.mxu0 }
 0x20c   : > { %v2124_v20 = vpop.eup %2123  ;;  %v1740_v21 = vmul.f32 -1.442695, %v923_v17  ;;  %v915_v22 = vadd.f32 %v2523_v47, %v914_v19 }
 0x20d   : > { %v2126_v23 = vpop.eup %2125  ;;  %v1930_v24 = vpop.f32.mrf.mxu0  ;;  %v999_v37 = vadd.f32 1.0, %v2124_v20 }
 0x20e   : > { %v2128_v25 = vpop.eup %2127  ;;  %2137 = vpow2.f32 %v1740_v21  ;;  %v1738_v26 = vmul.f32 -1.442695, %v915_v22  ;;  %v926_v27 = vadd.f32 %v1930_v24, %v2523_v47  ;;  %v1295_v24 = vld [vmem:[%s2726_s7 + $0x10] sm:$0x33] }
 0x20f   : > { %v2130_v28 = vpop.eup %2129  ;;  %v997_v29 = vadd.f32 1.0, %v2128_v25  ;;  %v917_v30 = vpop.f32.mrf.mxu0  ;;  %v1775_v25 = vcombine.high %v1295_v24, %v1295_v24 }
 0x210   : > { %v2132_v31 = vpop.eup %2131  ;;  %2139 = vpow2.f32 %v1738_v26  ;;  %v1741_v36 = vmul.f32 -1.442695, %v926_v27  ;;  %v918_v32 = vadd.f32 %v2523_v47, %v917_v30  ;;  %v1042_v41 = vpack.c.bf16 %v2130_v28, %v2122_v18  ;;  %v2048_v28 = vld [vmem:[%s2726_s7 + $0x4] ss:$8 sps:$4 sm:$0xff]  }
 0x211   : > { %v2134_v33 = vpop.eup %2133  ;;  %2141 = vrcp.f32 %v997_v29  ;;  %v1000_v34 = vadd.f32 1.0, %v2132_v31  ;;  %v1774_v26 = vcombine.low %v1295_v24, %v1295_v24  ;;  %1776 = vmatprep.subr.msk.bf16.mxu1 %vm844_vm0, %v1775_v25  ;;  %v2046_v29 = vld [vmem:[%s2726_s7] ss:$8 sps:$4 sm:$0xff]   ;;  %v2303_v30 = vmov 0  }
 0x212   : > { %v2136_v35 = vpop.eup %2135  ;;  %2143 = vpow2.f32 %v1741_v36  ;;  %v1739_v38 = vmul.f32 -1.442695, %v918_v32  ;;  %v1041_v39 = vpack.c.bf16 %v2134_v33, %v2126_v23  ;;  %v2564_v36 = vld [vmem:[%s2725_s6] ss:$0 sm:$0xff] }
 0x213   : > { %2145 = vrcp.f32 %v1000_v34  ;;  %v998_v40 = vadd.f32 1.0, %v2136_v35  ;;  %v1348_v27 = vsel %vm844_vm0, %v1774_v26, 0 }
 0x214   : > { %2147 = vpow2.f32 %v1739_v38  ;;  %1937 = vmatprep.mubr.msk.bf16.mxu1 %vm1063_vm3, %v1041_v39 }
 0x215   : > { %2149 = vrcp.f32 %v998_v40  ;;  %1938 = vmatmul.mubr.msk.bf16.vlgmr.msra.gmra.mxu1 %vm1063_vm3, %v1042_v41 }
 0x216   : > { %2151 = vrcp.f32 %v999_v37  ;;  %1366 = vmatpush1.bf16.msra.mxu1 %v1348_v27 }
 0x217   : > { %1367 = vmatprep.subr.bf16.mxu1 %v2048_v28 }
 0x21a   : > { %v1933_v42 = vpop.f32.mrf.mxu1  ;;  %1368 = vmatpush1.bf16.msra.mxu1 %v2046_v29 }
 0x21b   : > { %v2138_v43 = vpop.eup %2137  ;;  %v939_v44 = vadd.f32 %v1933_v42, %v2523_v47 }
 0x21c   : > { %v1003_v45 = vadd.f32 1.0, %v2138_v43  ;;  %v930_v46 = vpop.f32.mrf.mxu1 }
 0x21d   : > { %v2140_v48 = vpop.eup %2139  ;;  %v1744_v49 = vmul.f32 -1.442695, %v939_v44  ;;  %v931_v50 = vadd.f32 %v2523_v47, %v930_v46 }
 0x21e   : > { %v2142_v51 = vpop.eup %2141  ;;  %2153 = vrcp.f32 %v1003_v45  ;;  %v1001_v52 = vadd.f32 1.0, %v2140_v48  ;;  %v1934_v53 = vpop.f32.mrf.mxu1 }
 0x21f   : > { %v2144_v54 = vpop.eup %2143  ;;  %2155 = vpow2.f32 %v1744_v49  ;;  %v1742_v55 = vmul.f32 -1.442695, %v931_v50  ;;  %v942_v56 = vadd.f32 %v1934_v53, %v2523_v47 }
 0x220   : > { %v2146_v57 = vpop.eup %2145  ;;  %2157 = vrcp.f32 %v1001_v52  ;;  %v1004_v58 = vadd.f32 1.0, %v2144_v54  ;;  %v933_v59 = vpop.f32.mrf.mxu1 }
 0x221   : > { %v2148_v60 = vpop.eup %2147  ;;  %2159 = vpow2.f32 %v1742_v55  ;;  %v1745_v61 = vmul.f32 -1.442695, %v942_v56  ;;  %v934_v62 = vadd.f32 %v2523_v47, %v933_v59 }
 0x222   : > { %v2150_v63 = vpop.eup %2149  ;;  %2161 = vrcp.f32 %v1004_v58  ;;  %v1002_v0 = vadd.f32 1.0, %v2148_v60 }
 0x223   : > { %v2152_v1 = vpop.eup %2151  ;;  %2163 = vpow2.f32 %v1745_v61  ;;  %v1743_v2 = vmul.f32 -1.442695, %v934_v62  ;;  %v1043_v3 = vpack.c.bf16 %v2150_v63, %v2142_v51 }
 0x224   : > { %2165 = vrcp.f32 %v1002_v0  ;;  %v1044_v4 = vpack.c.bf16 %v2146_v57, %v2152_v1 }
 0x225   : > { %2167 = vpow2.f32 %v1743_v2  ;;  %1941 = vmatprep.mubr.msk.bf16.mxu1 %vm1063_vm3, %v1043_v3 }
 0x226   : > { %1942 = vmatmul.mubr.msk.bf16.gmra.mxu1 %vm1063_vm3, %v1044_v4 }
 0x22b   : > { %v2154_v5 = vpop.eup %2153 }
 0x22c   : > { %v2156_v6 = vpop.eup %2155 }
 0x22d   : > { %v2158_v7 = vpop.eup %2157  ;;  %v1007_v14 = vadd.f32 1.0, %v2156_v6 }
 0x22e   : > { %v2160_v8 = vpop.eup %2159 }
 0x22f   : > { %v2162_v9 = vpop.eup %2161  ;;  %v1005_v47 = vadd.f32 1.0, %v2160_v8 }
 0x230   : > { %v2164_v10 = vpop.eup %2163  ;;  %v1046_v17 = vpack.c.bf16 %v2162_v9, %v2154_v5 }
 0x231   : > { %v2166_v11 = vpop.eup %2165  ;;  %v1008_v12 = vadd.f32 1.0, %v2164_v10  ;;  %2169 = vrcp.f32 %v1005_v47 }
 0x232   : > { %v2168_v13 = vpop.eup %2167  ;;  %v1045_v15 = vpack.c.bf16 %v2166_v11, %v2158_v7 }
 0x233   : > { %v1006_v16 = vadd.f32 1.0, %v2168_v13  ;;  %2171 = vrcp.f32 %v1008_v12 }
 0x234   : > { %1945 = vmatprep.mubr.msk.bf16.mxu1 %vm1063_vm3, %v1045_v15 }
 0x235   : > { %2173 = vrcp.f32 %v1006_v16  ;;  %1946 = vmatmul.mubr.msk.bf16.gmra.mxu1 %vm1063_vm3, %v1046_v17 }
 0x236   : > { %2175 = vrcp.f32 %v1007_v14 }
 0x23e   : > { %v2170_v18 = vpop.eup %2169 }
 0x240   : > { %v2172_v19 = vpop.eup %2171 }
 0x242   : > { %v2174_v20 = vpop.eup %2173 }
 0x243   : > { %v2176_v21 = vpop.eup %2175  ;;  %v1047_v22 = vpack.c.bf16 %v2174_v20, %v2170_v18 }
 0x244   : > { %v1048_v23 = vpack.c.bf16 %v2172_v19, %v2176_v21 }
 0x245   : > { %1949 = vmatprep.mubr.msk.bf16.mxu1 %vm1063_vm3, %v1047_v22 }
 0x246   : > { %1950 = vmatmul.mubr.msk.bf16.gmra.mxu1 %vm1063_vm3, %v1048_v23 }
 0x247   : > { %1385 = vmatprep.mubr.bf16.mxu1 %v2303_v30 }
 0x2d5   : > { %v1939_v31 = vpop.f32.mrf.mxu1 }
 0x2d6   : > { %v1135_v39 = vadd.f32 %v1939_v31, %v2564_v36 }
 0x2d7   : > { %v1126_v32 = vpop.f32.mrf.mxu1 }
 0x2d8   : > { %v1127_v33 = vadd.f32 %v2564_v36, %v1126_v32  ;;  %v1758_v43 = vmul.f32 -1.442695, %v1135_v39 }
 0x2d9   : > { %v1940_v34 = vpop.f32.mrf.mxu1 }
 0x2da   : > { %v1756_v35 = vmul.f32 -1.442695, %v1127_v33  ;;  %v1138_v37 = vadd.f32 %v1940_v34, %v2564_v36 }
 0x2db   : > { %v1129_v38 = vpop.f32.mrf.mxu1 }
 0x2dc   : > { %2177 = vpow2.f32 %v1756_v35  ;;  %v1130_v40 = vadd.f32 %v2564_v36, %v1129_v38  ;;  %v1759_v41 = vmul.f32 -1.442695, %v1138_v37 }
 0x2de   : > { %v1757_v42 = vmul.f32 -1.442695, %v1130_v40 }
 0x2e0   : > { %2179 = vpow2.f32 %v1757_v42 }
 0x2e1   : > { %2181 = vpow2.f32 %v1759_v41 }
 0x2e2   : > { %2183 = vpow2.f32 %v1758_v43 }
 0x2e6   : > { %v1943_v44 = vpop.f32.mrf.mxu1 }
 0x2e7   : > { %v1151_v55 = vadd.f32 %v1943_v44, %v2564_v36 }
 0x2e8   : > { %v1142_v45 = vpop.f32.mrf.mxu1 }
 0x2e9   : > { %v2178_v46 = vpop.eup %2177  ;;  %v1143_v48 = vadd.f32 %v2564_v36, %v1142_v45  ;;  %v1762_v62 = vmul.f32 -1.442695, %v1151_v55 }
 0x2ea   : > { %v1944_v49 = vpop.f32.mrf.mxu1  ;;  %v1237_v50 = vadd.f32 1.0, %v2178_v46 }
 0x2eb   : > { %v1760_v51 = vmul.f32 -1.442695, %v1143_v48  ;;  %v1154_v52 = vadd.f32 %v1944_v49, %v2564_v36 }
 0x2ec   : > { %v1145_v53 = vpop.f32.mrf.mxu1 }
 0x2ed   : > { %v2180_v54 = vpop.eup %2179  ;;  %2185 = vpow2.f32 %v1760_v51  ;;  %v1146_v56 = vadd.f32 %v2564_v36, %v1145_v53  ;;  %v1763_v59 = vmul.f32 -1.442695, %v1154_v52 }
 0x2ee   : > { %v1238_v57 = vadd.f32 1.0, %v2180_v54  ;;  %v2182_v58 = vpop.eup %2181  ;;  %2187 = vrcp.f32 %v1237_v50 }
 0x2ef   : > { %v1761_v60 = vmul.f32 -1.442695, %v1146_v56  ;;  %v2184_v61 = vpop.eup %2183  ;;  %v1240_v63 = vadd.f32 1.0, %v2182_v58 }
 0x2f0   : > { %2189 = vrcp.f32 %v1238_v57  ;;  %v1239_v0 = vadd.f32 1.0, %v2184_v61 }
 0x2f1   : > { %2191 = vpow2.f32 %v1761_v60 }
 0x2f2   : > { %2193 = vpow2.f32 %v1763_v59 }
 0x2f3   : > { %2195 = vpow2.f32 %v1762_v62 }
 0x2f4   : > { %2197 = vrcp.f32 %v1240_v63 }
 0x2f5   : > { %v1947_v1 = vpop.f32.mrf.mxu1  ;;  %2199 = vrcp.f32 %v1239_v0 }
 0x2f6   : > { %v1167_v12 = vadd.f32 %v1947_v1, %v2564_v36 }
 0x2f7   : > { %v1158_v2 = vpop.f32.mrf.mxu1 }
 0x2f8   : > { %v1159_v3 = vadd.f32 %v2564_v36, %v1158_v2  ;;  %v1766_v19 = vmul.f32 -1.442695, %v1167_v12 }
 0x2f9   : > { %v1948_v4 = vpop.f32.mrf.mxu1 }
 0x2fa   : > { %v2186_v5 = vpop.eup %2185  ;;  %v1764_v6 = vmul.f32 -1.442695, %v1159_v3  ;;  %v1170_v8 = vadd.f32 %v1948_v4, %v2564_v36 }
 0x2fb   : > { %v1241_v7 = vadd.f32 1.0, %v2186_v5  ;;  %v1161_v9 = vpop.f32.mrf.mxu1  ;;  %v2188_v47 = vpop.eup %2187 }
 0x2fc   : > { %2201 = vpow2.f32 %v1764_v6  ;;  %v1162_v10 = vadd.f32 %v2564_v36, %v1161_v9  ;;  %v1767_v17 = vmul.f32 -1.442695, %v1170_v8 }
 0x2fd   : > { %v2190_v11 = vpop.eup %2189  ;;  %2203 = vrcp.f32 %v1241_v7 }
 0x2fe   : > { %v2192_v13 = vpop.eup %2191  ;;  %v1765_v14 = vmul.f32 -1.442695, %v1162_v10  ;;  %v1285_v15 = vpack.c.bf16 %v2190_v11, %v2188_v47  ;;  %v1298_v47 = vlaneseq }
 0x2ff   : > { %v1242_v16 = vadd.f32 1.0, %v2192_v13  ;;  %v2194_v18 = vpop.eup %2193  ;;  %v1296_v13 = vld [vmem:[%s2727_s8] sm:$0x3] }
 0x300   : > { %2205 = vpow2.f32 %v1765_v14  ;;  %1777 = vmatmul.mubr.msk.bf16.vlgmr.msra.gmra.mxu1 %vm819_vm1, %v1285_v15  ;;  %v2196_v20 = vpop.eup %2195  ;;  %v1244_v22 = vadd.f32 1.0, %v2194_v18  ;;  %v1299_v10 = vshrl.u32 %v1298_v47, 7 }
 0x301   : > { %2207 = vrcp.f32 %v1242_v16  ;;  %1395 = vmatprep.mubr.bf16.mxu1 %v2303_v30  ;;  %v2198_v21 = vpop.eup %2197  ;;  %v1243_v24 = vadd.f32 1.0, %v2196_v20 }
 0x302   : > { %2209 = vpow2.f32 %v1767_v17  ;;  %v2200_v23 = vpop.eup %2199  ;;  %v1300_v11 = vsub.s32 0, %v1299_v10  ;;  %v1304_v12 = vsub.s32 1, %v1299_v10 }
 0x303   : > { %2211 = vpow2.f32 %v1766_v19  ;;  %v1286_v26 = vpack.c.bf16 %v2198_v21, %v2200_v23 }
 0x304   : > { %2213 = vrcp.f32 %v1244_v22  ;;  %v2601_v14 = vrot.slane %v1296_v13, %v1300_v11  ;;  %v2603_v15 = vrot.slane %v1296_v13, %v1304_v12 }
 0x305   : > { %2215 = vrcp.f32 %v1243_v24 }
 0x306   : > { %v1951_v25 = vpop.f32.mrf.mxu1 }
 0x307   : > { %v1183_v39 = vadd.f32 %v1951_v25, %v2564_v36 }
 0x308   : > { %v1174_v27 = vpop.f32.mrf.mxu1  ;;  %1778 = vmatmul.mubr.msk.bf16.gmra.mxu1 %vm819_vm1, %v1286_v26 }
 0x309   : > { %v2202_v28 = vpop.eup %2201  ;;  %v1175_v29 = vadd.f32 %v2564_v36, %v1174_v27  ;;  %1405 = vmatprep.mubr.bf16.mxu1 %v2303_v30  ;;  %v1770_v48 = vmul.f32 -1.442695, %v1183_v39 }
 0x30a   : > { %v1952_v31 = vpop.f32.mrf.mxu1  ;;  %v1245_v32 = vadd.f32 1.0, %v2202_v28  ;;  %v2204_v35 = vpop.eup %2203 }
 0x30b   : > { %v1768_v33 = vmul.f32 -1.442695, %v1175_v29  ;;  %v1186_v34 = vadd.f32 %v1952_v31, %v2564_v36 }
 0x30c   : > { %v1177_v37 = vpop.f32.mrf.mxu1 }
 0x30d   : > { %v2206_v38 = vpop.eup %2205  ;;  %2217 = vpow2.f32 %v1768_v33  ;;  %v1178_v40 = vadd.f32 %v2564_v36, %v1177_v37  ;;  %v1771_v43 = vmul.f32 -1.442695, %v1186_v34 }
 0x30e   : > { %v2208_v41 = vpop.eup %2207  ;;  %v1246_v42 = vadd.f32 1.0, %v2206_v38  ;;  %2219 = vrcp.f32 %v1245_v32 }
 0x30f   : > { %v1769_v44 = vmul.f32 -1.442695, %v1178_v40  ;;  %v1287_v45 = vpack.c.bf16 %v2208_v41, %v2204_v35  ;;  %v2210_v46 = vpop.eup %2209 }
 0x310   : > { %2221 = vrcp.f32 %v1246_v42  ;;  %v2212_v49 = vpop.eup %2211  ;;  %v1248_v50 = vadd.f32 1.0, %v2210_v46 }
 0x311   : > { %2223 = vpow2.f32 %v1769_v44  ;;  %1779 = vmatmul.mubr.msk.bf16.gmra.mxu1 %vm819_vm1, %v1287_v45  ;;  %v2214_v51 = vpop.eup %2213  ;;  %v1247_v52 = vadd.f32 1.0, %v2212_v49 }
 0x312   : > { %1415 = vmatprep.mubr.bf16.mxu1 %v2303_v30  ;;  %2225 = vpow2.f32 %v1771_v43  ;;  %v2216_v36 = vpop.eup %2215 }
 0x313   : > { %2227 = vpow2.f32 %v1770_v48  ;;  %v1288_v53 = vpack.c.bf16 %v2214_v51, %v2216_v36 }
 0x314   : > { %2229 = vrcp.f32 %v1248_v50 }
 0x315   : > { %2231 = vrcp.f32 %v1247_v52 }
 0x319   : > { %1780 = vmatmul.mubr.msk.bf16.gmra.mxu1 %vm819_vm1, %v1288_v53 }
 0x31a   : > { %v2218_v54 = vpop.eup %2217  ;;  %1425 = vmatprep.mubr.bf16.mxu1 %v2303_v30 }
 0x31b   : > { %v2220_v55 = vpop.eup %2219  ;;  %v1249_v56 = vadd.f32 1.0, %v2218_v54 }
 0x31d   : > { %v2222_v57 = vpop.eup %2221  ;;  %2233 = vrcp.f32 %v1249_v56 }
 0x31e   : > { %v2224_v58 = vpop.eup %2223  ;;  %v1289_v59 = vpack.c.bf16 %v2222_v57, %v2220_v55 }
 0x31f   : > { %v1250_v60 = vadd.f32 1.0, %v2224_v58  ;;  %v2226_v61 = vpop.eup %2225 }
 0x320   : > { %v2228_v62 = vpop.eup %2227  ;;  %v1252_v63 = vadd.f32 1.0, %v2226_v61 }
 0x321   : > { %2235 = vrcp.f32 %v1250_v60  ;;  %1781 = vmatmul.mubr.msk.bf16.gmra.mxu1 %vm819_vm1, %v1289_v59  ;;  %v2230_v0 = vpop.eup %2229  ;;  %v1251_v1 = vadd.f32 1.0, %v2228_v62 }
 0x322   : > { %1435 = vmatprep.mubr.bf16.mxu1 %v2303_v30  ;;  %v2232_v2 = vpop.eup %2231  ;;  %2237 = vrcp.f32 %v1252_v63 }
 0x323   : > { %v1290_v3 = vpack.c.bf16 %v2230_v0, %v2232_v2  ;;  %2239 = vrcp.f32 %v1251_v1 }
 0x329   : > { %1782 = vmatmul.mubr.msk.bf16.gmra.mxu1 %vm819_vm1, %v1290_v3 }
 0x32a   : > { %1445 = vmatprep.mubr.bf16.mxu1 %v2303_v30  ;;  %v2234_v4 = vpop.eup %2233 }
 0x32e   : > { %v2236_v5 = vpop.eup %2235 }
 0x32f   : > { %v1291_v6 = vpack.c.bf16 %v2236_v5, %v2234_v4  ;;  %v2238_v7 = vpop.eup %2237 }
 0x330   : > { %v2240_v8 = vpop.eup %2239 }
 0x331   : > { %1783 = vmatmul.mubr.msk.bf16.gmra.mxu1 %vm819_vm1, %v1291_v6  ;;  %v1292_v9 = vpack.c.bf16 %v2238_v7, %v2240_v8 }
 0x332   : > { %1455 = vmatprep.mubr.bf16.mxu1 %v2303_v30 }
 0x339   : > { %1784 = vmatmul.mubr.msk.bf16.gmra.mxu1 %vm819_vm1, %v1292_v9 }
 0x3c0   : > { %v1387_v16 = vpop.f32.mrf.mxu1 }
 0x3c1   : > { %v1388_v17 = vadd.f32 %v1387_v16, %v2601_v14 }
 0x3c2   : > { %v1389_v30 = vpop.f32.mrf.mxu1 }
 0x3c3   : > { %v1390_v18 = vadd.f32 %v1389_v30, %v2603_v15 }
 0x3c4   : > { %v1391_v19 = vpop.f32.mrf.mxu1 }
 0x3c5   : > { %v1813_v20 = vpack.c.bf16 %v1390_v18, %v1388_v17  ;;  %v1392_v22 = vadd.f32 %v1391_v19, %v2601_v14 }
 0x3c6   : > { %v1393_v21 = vpop.f32.mrf.mxu1 }
 0x3c7   : > { %1562 = vst [vmem:[%s2609_s22] sm:$0xff] %v1813_v20  ;;  %v1394_v23 = vadd.f32 %v1393_v21, %v2603_v15 }
 0x3c8   : > { %v1397_v24 = vpop.f32.mrf.mxu1 }
 0x3c9   : > { %v1814_v25 = vpack.c.bf16 %v1394_v23, %v1392_v22  ;;  %v1398_v27 = vadd.f32 %v1397_v24, %v2601_v14 }
 0x3ca   : > { %v1399_v26 = vpop.f32.mrf.mxu1 }
 0x3cb   : > { %1563 = vst [vmem:[%s2609_s22 + $0x8] sm:$0xff] %v1814_v25  ;;  %v1400_v28 = vadd.f32 %v1399_v26, %v2603_v15 }
 0x3cc   : > { %v1401_v29 = vpop.f32.mrf.mxu1 }
 0x3cd   : > { %v1815_v31 = vpack.c.bf16 %v1400_v28, %v1398_v27  ;;  %v1402_v33 = vadd.f32 %v1401_v29, %v2601_v14 }
 0x3ce   : > { %v1403_v32 = vpop.f32.mrf.mxu1 }
 0x3cf   : > { %1564 = vst [vmem:[%s2609_s22 + $0x10] sm:$0xff] %v1815_v31  ;;  %v1404_v34 = vadd.f32 %v1403_v32, %v2603_v15 }
 0x3d1   : > { %v1816_v35 = vpack.c.bf16 %v1404_v34, %v1402_v33  ;;  %v1407_v37 = vpop.f32.mrf.mxu1 }
 0x3d2   : > { %v1408_v39 = vadd.f32 %v1407_v37, %v2601_v14 }
 0x3d3   : > { %1565 = vst [vmem:[%s2609_s22 + $0x18] sm:$0xff] %v1816_v35  ;;  %v1409_v38 = vpop.f32.mrf.mxu1 }
 0x3d4   : > { %v1410_v40 = vadd.f32 %v1409_v38, %v2603_v15 }
 0x3d5   : > { %v1411_v41 = vpop.f32.mrf.mxu1 }
 0x3d6   : > { %v1817_v42 = vpack.c.bf16 %v1410_v40, %v1408_v39  ;;  %v1412_v44 = vadd.f32 %v1411_v41, %v2601_v14 }
 0x3d7   : > { %v1413_v43 = vpop.f32.mrf.mxu1 }
 0x3d8   : > { %1566 = vst [vmem:[%s2609_s22 + $0x20] sm:$0xff] %v1817_v42  ;;  %v1414_v45 = vadd.f32 %v1413_v43, %v2603_v15 }
 0x3d9   : > { %v1417_v46 = vpop.f32.mrf.mxu1 }
 0x3da   : > { %v1818_v48 = vpack.c.bf16 %v1414_v45, %v1412_v44  ;;  %v1418_v50 = vadd.f32 %v1417_v46, %v2601_v14 }
 0x3db   : > { %v1419_v49 = vpop.f32.mrf.mxu1 }
 0x3dc   : > { %1567 = vst [vmem:[%s2609_s22 + $0x28] sm:$0xff] %v1818_v48  ;;  %v1420_v51 = vadd.f32 %v1419_v49, %v2603_v15 }
 0x3dd   : > { %v1421_v52 = vpop.f32.mrf.mxu1 }
 0x3de   : > { %v1819_v36 = vpack.c.bf16 %v1420_v51, %v1418_v50  ;;  %v1422_v54 = vadd.f32 %v1421_v52, %v2601_v14 }
 0x3df   : > { %v1423_v53 = vpop.f32.mrf.mxu1 }
 0x3e0   : > { %1568 = vst [vmem:[%s2609_s22 + $0x30] sm:$0xff] %v1819_v36  ;;  %v1424_v55 = vadd.f32 %v1423_v53, %v2603_v15 }
 0x3e1   : > { %v1427_v56 = vpop.f32.mrf.mxu1 }
 0x3e2   : > { %v1820_v57 = vpack.c.bf16 %v1424_v55, %v1422_v54  ;;  %v1428_v59 = vadd.f32 %v1427_v56, %v2601_v14 }
 0x3e3   : > { %v1429_v58 = vpop.f32.mrf.mxu1 }
 0x3e4   : > { %1569 = vst [vmem:[%s2609_s22 + $0x38] sm:$0xff] %v1820_v57  ;;  %v1430_v60 = vadd.f32 %v1429_v58, %v2603_v15 }
 0x3e5   : > { %v1431_v61 = vpop.f32.mrf.mxu1 }
 0x3e6   : > { %v1821_v62 = vpack.c.bf16 %v1430_v60, %v1428_v59  ;;  %v1432_v0 = vadd.f32 %v1431_v61, %v2601_v14 }
 0x3e7   : > { %v1433_v63 = vpop.f32.mrf.mxu1 }
 0x3e8   : > { %1570 = vst [vmem:[%s2609_s22 + $0x40] sm:$0xff] %v1821_v62  ;;  %v1434_v1 = vadd.f32 %v1433_v63, %v2603_v15 }
 0x3e9   : > { %v1437_v2 = vpop.f32.mrf.mxu1 }
 0x3ea   : > { %v1822_v3 = vpack.c.bf16 %v1434_v1, %v1432_v0  ;;  %v1438_v5 = vadd.f32 %v1437_v2, %v2601_v14 }
 0x3eb   : > { %v1439_v4 = vpop.f32.mrf.mxu1 }
 0x3ec   : > { %1571 = vst [vmem:[%s2609_s22 + $0x48] sm:$0xff] %v1822_v3  ;;  %v1440_v6 = vadd.f32 %v1439_v4, %v2603_v15 }
 0x3ed   : > { %v1441_v7 = vpop.f32.mrf.mxu1 }
 0x3ee   : > { %v1823_v8 = vpack.c.bf16 %v1440_v6, %v1438_v5  ;;  %v1442_v47 = vadd.f32 %v1441_v7, %v2601_v14 }
 0x3ef   : > { %v1443_v9 = vpop.f32.mrf.mxu1 }
 0x3f0   : > { %1572 = vst [vmem:[%s2609_s22 + $0x50] sm:$0xff] %v1823_v8  ;;  %v1444_v10 = vadd.f32 %v1443_v9, %v2603_v15 }
 0x3f1   : > { %v1447_v11 = vpop.f32.mrf.mxu1 }
 0x3f2   : > { %v1824_v12 = vpack.c.bf16 %v1444_v10, %v1442_v47  ;;  %v1448_v16 = vadd.f32 %v1447_v11, %v2601_v14 }
 0x3f3   : > { %v1449_v13 = vpop.f32.mrf.mxu1 }
 0x3f4   : > { %1573 = vst [vmem:[%s2609_s22 + $0x58] sm:$0xff] %v1824_v12  ;;  %v1450_v30 = vadd.f32 %v1449_v13, %v2603_v15 }
 0x3f5   : > { %v1451_v17 = vpop.f32.mrf.mxu1 }
 0x3f6   : > { %v1825_v18 = vpack.c.bf16 %v1450_v30, %v1448_v16  ;;  %v1452_v20 = vadd.f32 %v1451_v17, %v2601_v14 }
 0x3f7   : > { %v1453_v19 = vpop.f32.mrf.mxu1 }
 0x3f8   : > { %1574 = vst [vmem:[%s2609_s22 + $0x60] sm:$0xff] %v1825_v18  ;;  %v1454_v21 = vadd.f32 %v1453_v19, %v2603_v15 }
 0x3f9   : > { %v1457_v22 = vpop.f32.mrf.mxu1 }
 0x3fa   : > { %v1826_v23 = vpack.c.bf16 %v1454_v21, %v1452_v20  ;;  %v1458_v25 = vadd.f32 %v1457_v22, %v2601_v14 }
 0x3fb   : > { %v1459_v24 = vpop.f32.mrf.mxu1 }
 0x3fc   : > { %1575 = vst [vmem:[%s2609_s22 + $0x68] sm:$0xff] %v1826_v23  ;;  %v1460_v26 = vadd.f32 %v1459_v24, %v2603_v15 }
 0x3fd   : > { %v1461_v27 = vpop.f32.mrf.mxu1 }
 0x3fe   : > { %v1827_v28 = vpack.c.bf16 %v1460_v26, %v1458_v25  ;;  %v1462_v31 = vadd.f32 %v1461_v27, %v2601_v14 }
 0x3ff   : > { %v1463_v29 = vpop.f32.mrf.mxu1 }
 0x400   : > { %1576 = vst [vmem:[%s2609_s22 + $0x70] sm:$0xff] %v1827_v28  ;;  %v1464_v32 = vadd.f32 %v1463_v29, %v2603_v15  ;;  %1585 = sbr.rel (!%p2395_p5) target bundleno = 1056 (0x420), region = 60 }
 0x402   : > { %v1828_v33 = vpack.c.bf16 %v1464_v32, %v1462_v31 }
 0x404   : > { %1577 = vst [vmem:[%s2609_s22 + $0x78] sm:$0xff] %v1828_v33 }
 0x405   : > { %s2736_s28 = smov (!%p1588_p11, %s1587_s28), 16 }
 0x406   : > { %s2664_s14 = sshll.u32 %s2736_s28, 7 }
 0x407   : > { %s1593_s16 = ssub.s32 2048, %s2664_s14 }
 0x408   : > { %1594 = vsyncadd %s2659_s29, %s1593_s16  ;;  %p1805_p12 = scmp.ne.s32.totalorder %s2664_s14, 0  ;;  %s1831_s17 = sshll.u32 %s2378_s13, 11 }
 0x409   : > { %s2673_s24 = scalar_lea.hbm %s2728_s9, %s1831_s17  ;;  %s1600_s23 = sshll.u32 %s2609_s22, 4  ;;  %s2676_s23 = int_to_ptr.vmem [resolvable:$true] %s1600_s23 }
 0x40a   : > { %s2241_s25 = scalar_lea.vmem %s2676_s23, %s2664_s14  ;;  %s2304_s26 = smov [#allocation2]  }
 0x40b   : > { %p2242_p13 = scmp.ne.s32.totalorder %s2676_s23, %s2241_s25  ;;  %s2245_s27 = sshll.u32 %s2304_s26, 4  ;;  %s2246_s27 = int_to_ptr.vmem [resolvable:$false] %s2245_s27 }
 0x40c   : > { %s2247_s13 = scalar_lea.vmem %s2246_s27, 4096  ;;  %p2248_p2 = scmp.lt.s32.totalorder %s2676_s23, %s2246_s27 }
 0x40d   : > { %p2243_p0 = pnand %p2242_p13, %p1805_p12  ;;  %p2249_p3 = scmp.lt.s32.totalorder %s2247_s13, %s2241_s25 }
 0x40f   : > { %p2244_p1 = pneg %p2243_p0  ;;  %p2250_p4 = por %p2249_p3, %p2248_p2 }
 0x411   : > { %p2251_p5 = pnand %p2250_p4, %p2244_p1 }
 0x413   : > { %2254 = shalt.err (!%p2251_p5)
}
 0x414   : > { %s2255_s22 = scalar_lea.hbm %s2673_s24, %s2664_s14  ;;  %s2259_s17 = scalar_lea.hbm %s2728_s9, 4864 }
 0x415   : > { %p2256_p7 = scmp.ne.s32.totalorder %s2673_s24, %s2255_s22  ;;  %p2260_p10 = scmp.lt.s32.totalorder %s2673_s24, %s2728_s9 }
 0x416   : > { %p2261_p11 = scmp.lt.s32.totalorder %s2259_s17, %s2255_s22 }
 0x417   : > { %p2257_p8 = pnand %p2256_p7, %p1805_p12 }
 0x418   : > { %p2262_p13 = por %p2261_p11, %p2260_p10 }
 0x419   : > { %p2258_p9 = pneg %p2257_p8 }
 0x41b   : > { %p2263_p0 = pnand %p2262_p13, %p2258_p9 }
 0x41d   : > { %2266 = shalt.err (!%p2263_p0)
}
 0x41e   : > { %s2305_s25 = smov 128   ;;  %s2306_s26 = smov 8  }
 0x41f   : > { %1606 = dma.vmem_to_hbm [thread:$0]  (%p1805_p12), %s2676_s23, %s2664_s14, %s2673_s24, %s2659_s29, %s2305_s25, %s2305_s25, %s2306_s26  }
 0x420 PF: > { %p1965_p1 = scmp.ge.s32.totalorder %s2301_s12, 2  ;;  %s1615_s27 = sand.u32 1, %s2289_s30  }
 0x421   : > { %s1616_s13 = scalar_lea.sflag [#allocation3], %s1615_s27 }
 0x422   : > { %p1962_p2 = pnand %p1965_p1, %p2399_p6 }
 0x424   : > { %p1963_p3 = pneg %p1962_p2 }
 0x426   : > { %2284 = dma.done.wait (%p1963_p3), %s1616_s13, 2048  }
 0x427   : > { %2286 = vsyncadd (%p1963_p3), %s1616_s13, 4294965248  ;;  %p19_p4 = scmp.ge.s32.totalorder %s2382_s15, 5   ;;  %s2731_s30 = smov %s2293_s10 }
 0x428   : > { %s2732_s10 = smov %s2297_s11  ;;  %s2733_s11 = smov %s2393_s18 }
 0x429   : > { %s2734_s12 = smov %s2382_s15  ;;  %21 = sbr.rel (!%p19_p4) target bundleno = 3 (0x3), region = 91 }
 0x42e   :  { %1621 = vsyncpa [#allocation3], 1 }
 0x42f   :  { %1623 = vsyncpa [#allocation3 + $0x1], 1 }

</bundles_post_ra>
